<compile_context>
chip_gen: v7x
topology: tpu7x:2x2x1
jax: 0.10.0
libtpu: 0.0.40
codegen_flags: <defaults>
</compile_context>

<pallas_src>
import jax
import jax.numpy as jnp
from jax.experimental import pallas as pl
from jax.experimental.pallas import tpu as pltpu


def _round_up(x, m):
    return (x + m - 1) // m * m


def rl_agent_kernel(x_ref, w1_ref, b1_ref, w2_ref, b2_ref, out_ref):
    # Cast f32 input tile to bf16 in-kernel (MXU-native operands, f32 accum).
    x_bf16 = x_ref[...].astype(jnp.bfloat16)
    # fc: (tb, in) @ (in, H) on the MXU.
    h = jnp.dot(x_bf16, w1_ref[...], preferred_element_type=jnp.float32)
    # Bias + ReLU in f32 on the VPU (free filler under DMA slack).
    h = jnp.maximum(h + b1_ref[...], 0.0)
    # fc_out: bf16 activations @ bf16 W2, f32 accumulate.
    o = jnp.dot(h.astype(jnp.bfloat16), w2_ref[...],
                preferred_element_type=jnp.float32)
    out_ref[...] = (o + b2_ref[...]).astype(out_ref.dtype)


def prepare_rl_agent_params(w1, b1, w2, b2):
    """One-time weight prep (hoist out of the per-call hot path).

    Weights are stored pre-transposed relative to nn.Linear ([in, out]) so the
    kernel computes plain x @ W + b. Weights go bf16 (MXU-native); biases stay
    f32 2-D rows (added to the f32 accumulator).
    """
    return (w1.astype(jnp.bfloat16),
            b1.reshape(1, -1).astype(jnp.float32),
            w2.astype(jnp.bfloat16),
            b2.reshape(1, -1).astype(jnp.float32))


def rl_agent_forward(x, w1_bf16, b1_2d, w2_bf16, b2_2d, *, block_b=2048):
    """x: [B, in_dim] f32, prepped params from prepare_rl_agent_params.

    Returns [B, output_dim] float32.
    """
    B, input_dim = x.shape
    hidden_dim = w1_bf16.shape[1]
    output_dim = w2_bf16.shape[1]

    # Batch tile: multiple of 16 (bf16 sublane packing), aim for >=2 grid
    # steps so v7x's two TensorCores both get work, never larger than the
    # sublane-rounded batch.
    tb = min(block_b, max(16, _round_up(pl.cdiv(B, 2), 16)))
    tb = min(tb, _round_up(B, 8))
    grid = (pl.cdiv(B, tb),)

    flops = 2 * B * (input_dim * hidden_dim + hidden_dim * output_dim)
    bytes_accessed = (B * input_dim * 4                    # x read (f32)
                      + w1_bf16.size * 2 + w2_bf16.size * 2
                      + b1_2d.size * 4 + b2_2d.size * 4
                      + B * output_dim * 4)                # out write (f32)

    return pl.pallas_call(
        rl_agent_kernel,
        out_shape=jax.ShapeDtypeStruct((B, output_dim), jnp.float32),
        grid=grid,
        in_specs=[
            pl.BlockSpec((tb, input_dim), lambda i: (i, 0)),          # x tile
            pl.BlockSpec((input_dim, hidden_dim), lambda i: (0, 0)),  # W1 (resident)
            pl.BlockSpec((1, hidden_dim), lambda i: (0, 0)),          # b1 (resident)
            pl.BlockSpec((hidden_dim, output_dim), lambda i: (0, 0)), # W2 (resident)
            pl.BlockSpec((1, output_dim), lambda i: (0, 0)),          # b2 (resident)
        ],
        out_specs=pl.BlockSpec((tb, output_dim), lambda i: (i, 0)),
        compiler_params=pltpu.CompilerParams(
            dimension_semantics=("parallel",)),
        cost_estimate=pl.CostEstimate(
            flops=flops, transcendentals=0, bytes_accessed=bytes_accessed),
    )(x, w1_bf16, b1_2d, w2_bf16, b2_2d)


def reference_forward_f32(x, w1, b1, w2, b2):
    h = jnp.maximum(x @ w1 + b1, 0.0)
    return h @ w2 + b2


def reference_forward_bf16(x, w1, b1, w2, b2):
    # Mimics the kernel's bf16-operand / f32-accumulate numerics.
    up = lambda a: a.astype(jnp.bfloat16).astype(jnp.float32)
    h = jnp.maximum(up(x) @ up(w1) + b1, 0.0)
    return up(h) @ up(w2) + b2


if __name__ == "__main__":
    # Small shapes consistent with the module: input_dim=32, hidden=64, out=16.
    input_dim, hidden_dim, output_dim = 32, 64, 16

    key = jax.random.PRNGKey(0)
    k_x, k_w1, k_b1, k_w2, k_b2 = jax.random.split(key, 5)

    # Deterministic init mimicking nn.Linear's uniform(-1/sqrt(fan_in), +) init.
    def lin_init(kw, kb, fan_in, fan_out):
        bound = 1.0 / jnp.sqrt(fan_in)
        # PyTorch stores W as [out, in]; we keep it pre-transposed as [in, out].
        w = jax.random.uniform(kw, (fan_in, fan_out), jnp.float32, -bound, bound)
        b = jax.random.uniform(kb, (fan_out,), jnp.float32, -bound, bound)
        return w, b

    w1, b1 = lin_init(k_w1, k_b1, input_dim, hidden_dim)
    w2, b2 = lin_init(k_w2, k_b2, hidden_dim, output_dim)

    # One-time weight prep (out of the hot path).
    params = prepare_rl_agent_params(w1, b1, w2, b2)

    # Case 1: tiny batch (single grid step).
    batch = 8
    x = jax.random.normal(k_x, (batch, input_dim), dtype=jnp.float32)
    out = jax.block_until_ready(rl_agent_forward(x, *params))
    assert out.shape == (batch, output_dim)
    assert jnp.allclose(out, reference_forward_bf16(x, w1, b1, w2, b2),
                        atol=1e-3, rtol=1e-3)
    assert jnp.allclose(out, reference_forward_f32(x, w1, b1, w2, b2),
                        atol=5e-2, rtol=5e-2)

    # Case 2: ragged batch (2 grid steps, last block partially masked).
    batch2 = 40
    x2 = jax.random.normal(jax.random.PRNGKey(1), (batch2, input_dim),
                           dtype=jnp.float32)
    out2 = jax.block_until_ready(rl_agent_forward(x2, *params))
    assert out2.shape == (batch2, output_dim)
    assert jnp.allclose(out2, reference_forward_bf16(x2, w1, b1, w2, b2),
                        atol=1e-3, rtol=1e-3)

    print("KERNEL_OK")
</pallas_src>

<mosaic_0001>
module attributes {stable_mosaic.version = 11 : i64} {
  func.func @rl_agent_kernel(%arg0: i32, %arg1: memref<8x32xf32, #tpu.memory_space<vmem>>, %arg2: memref<32x64xbf16, #tpu.memory_space<vmem>>, %arg3: memref<1x64xf32, #tpu.memory_space<vmem>>, %arg4: memref<64x16xbf16, #tpu.memory_space<vmem>>, %arg5: memref<1x16xf32, #tpu.memory_space<vmem>>, %arg6: memref<8x16xf32, #tpu.memory_space<vmem>>) attributes {dimension_semantics = [#tpu.dimension_semantics<parallel>], iteration_bounds = array<i64: 1>, scalar_prefetch = 0 : i64, scratch_operands = 0 : i64, tpu.core_type = #tpu.core_type<tc>, window_params = [{transform_indices = @transform_0, window_bounds = array<i64: 8, 32>}, {pipeline_mode = #tpu.pipeline_mode<synchronous>, transform_indices = @transform_1, window_bounds = array<i64: 32, 64>}, {pipeline_mode = #tpu.pipeline_mode<synchronous>, transform_indices = @transform_2, window_bounds = array<i64: 1, 64>}, {pipeline_mode = #tpu.pipeline_mode<synchronous>, transform_indices = @transform_3, window_bounds = array<i64: 64, 16>}, {pipeline_mode = #tpu.pipeline_mode<synchronous>, transform_indices = @transform_4, window_bounds = array<i64: 1, 16>}, {transform_indices = @transform_5, window_bounds = array<i64: 8, 16>}]} {
    %c0 = arith.constant 0 : index
    %c0_0 = arith.constant 0 : index
    %0 = vector.load %arg1[%c0, %c0_0] : memref<8x32xf32, #tpu.memory_space<vmem>>, vector<8x32xf32>
    %1 = arith.truncf %0 : vector<8x32xf32> to vector<8x32xbf16>
    %c0_1 = arith.constant 0 : index
    %c0_2 = arith.constant 0 : index
    %2 = vector.load %arg2[%c0_1, %c0_2] : memref<32x64xbf16, #tpu.memory_space<vmem>>, vector<32x64xbf16>
    %cst = arith.constant dense<0.000000e+00> : vector<8x64xf32>
    %3 = tpu.matmul %1, %2, %cst {dimension_numbers = #tpu.dot_dimension_numbers<[1], [0], [0], [1], [0, 0, 1, 1], [], []>} : vector<8x32xbf16>, vector<32x64xbf16>, vector<8x64xf32> -> vector<8x64xf32>
    %c0_3 = arith.constant 0 : index
    %c0_4 = arith.constant 0 : index
    %4 = vector.load %arg3[%c0_3, %c0_4] : memref<1x64xf32, #tpu.memory_space<vmem>>, vector<1x64xf32>
    %5 = vector.broadcast %4 : vector<1x64xf32> to vector<8x64xf32>
    %6 = arith.addf %3, %5 : vector<8x64xf32>
    %cst_5 = arith.constant 0.000000e+00 : f32
    %7 = vector.broadcast %cst_5 : f32 to vector<8x64xf32>
    %8 = arith.maximumf %6, %7 : vector<8x64xf32>
    %9 = arith.truncf %8 : vector<8x64xf32> to vector<8x64xbf16>
    %c0_6 = arith.constant 0 : index
    %c0_7 = arith.constant 0 : index
    %10 = vector.load %arg4[%c0_6, %c0_7] : memref<64x16xbf16, #tpu.memory_space<vmem>>, vector<64x16xbf16>
    %cst_8 = arith.constant dense<0.000000e+00> : vector<8x16xf32>
    %11 = tpu.matmul %9, %10, %cst_8 {dimension_numbers = #tpu.dot_dimension_numbers<[1], [0], [0], [1], [0, 0, 1, 1], [], []>} : vector<8x64xbf16>, vector<64x16xbf16>, vector<8x16xf32> -> vector<8x16xf32>
    %c0_9 = arith.constant 0 : index
    %c0_10 = arith.constant 0 : index
    %12 = vector.load %arg5[%c0_9, %c0_10] : memref<1x16xf32, #tpu.memory_space<vmem>>, vector<1x16xf32>
    %13 = vector.broadcast %12 : vector<1x16xf32> to vector<8x16xf32>
    %14 = arith.addf %11, %13 : vector<8x16xf32>
    %c0_11 = arith.constant 0 : index
    %c0_12 = arith.constant 0 : index
    %15 = vector.load %arg6[%c0_11, %c0_12] : memref<8x16xf32, #tpu.memory_space<vmem>>, vector<8x16xf32>
    tpu.vector_store %arg6[%c0_11, %c0_12], %14 {strides = array<i32>} : memref<8x16xf32, #tpu.memory_space<vmem>>, vector<8x16xf32>,
    return
  }
  func.func @transform_0(%arg0: i32) -> (i32, i32) {
    %c0_i32 = arith.constant 0 : i32
    %c0_i32_0 = arith.constant 0 : i32
    return %arg0, %c0_i32 : i32, i32
  }
  func.func @transform_1(%arg0: i32) -> (i32, i32) {
    %c0_i32 = arith.constant 0 : i32
    %c0_i32_0 = arith.constant 0 : i32
    %c0_i32_1 = arith.constant 0 : i32
    return %c0_i32, %c0_i32_0 : i32, i32
  }
  func.func @transform_2(%arg0: i32) -> (i32, i32) {
    %c0_i32 = arith.constant 0 : i32
    %c0_i32_0 = arith.constant 0 : i32
    %c0_i32_1 = arith.constant 0 : i32
    return %c0_i32, %c0_i32_0 : i32, i32
  }
  func.func @transform_3(%arg0: i32) -> (i32, i32) {
    %c0_i32 = arith.constant 0 : i32
    %c0_i32_0 = arith.constant 0 : i32
    %c0_i32_1 = arith.constant 0 : i32
    return %c0_i32, %c0_i32_0 : i32, i32
  }
  func.func @transform_4(%arg0: i32) -> (i32, i32) {
    %c0_i32 = arith.constant 0 : i32
    %c0_i32_0 = arith.constant 0 : i32
    %c0_i32_1 = arith.constant 0 : i32
    return %c0_i32, %c0_i32_0 : i32, i32
  }
  func.func @transform_5(%arg0: i32) -> (i32, i32) {
    %c0_i32 = arith.constant 0 : i32
    %c0_i32_0 = arith.constant 0 : i32
    return %arg0, %c0_i32 : i32, i32
  }
}

</mosaic_0001>

<bundles_post_ra>
// kernel: tpu_custom_call.1
= control target key start
LH: loop header
LB: loop body
LE: loop exit
PB: predicated region body
PF: predicated region fallthrough
CT: control target
= control target key end

     0   :  { %v263_v1 = vmov 0.0   ;;  %vm264_vm0 = vmmov 0   ;;  %vm47_vm1 = vcmask 261120   ;;  %s335_s0 = inlined_call_operand.vmem [shape: f32[8,32], index: 0, kind: input, shape index: {}]   ;;  %s336_s1 = inlined_call_operand.vmem [shape: bf16[32,64], index: 1, kind: input, shape index: {}]   ;;  %s337_s2 = inlined_call_operand.vmem [shape: f32[1,64], index: 2, kind: input, shape index: {}]   ;;  %s338_s3 = inlined_call_operand.vmem [shape: bf16[64,16], index: 3, kind: input, shape index: {}]   ;;  %s339_s4 = inlined_call_operand.vmem [shape: f32[1,16], index: 4, kind: input, shape index: {}]   ;;  %s340_s5 = inlined_call_operand.hbm [shape: f32[8,16], index: 5, kind: output, shape index: {}]  }
   0x1   :  { %v233_v0 = vld [vmem:[%s336_s1] sm:$0xff]   ;;  %210 = vmatprep.subr.bf16.mxu0 %v263_v1  ;;  %v234_v2 = vld [vmem:[%s336_s1 + $0x8] sm:$0xff]   ;;  %218 = vmatprep.subr.bf16.mxu1 %v263_v1 }
   0x2   :  { %211 = vmatpush3.bf16.msra.mxu0 %v233_v0  ;;  %214 = vmatprep.mubr.msk.bf16.mxu0 %vm264_vm0, %v263_v1  ;;  %v22_v3 = vld [vmem:[%s335_s0] sm:$0xff]  ;;  %v236_v5 = vld [vmem:[%s338_s3 + $0x8] sm:$0xff]  }
   0x3   :  { %212 = vmatprep.subr.bf16.mxu0 %v263_v1  ;;  %v235_v4 = vld [vmem:[%s338_s3] sm:$0xff]   ;;  %226 = vmatprep.mubr.msk.bf16.mxu1 %vm264_vm0, %v263_v1  ;;  %v23_v6 = vpack.c.bf16 %v22_v3, %v22_v3 }
   0x4   :  { %219 = vmatpush3.bf16.msra.mxu1 %v235_v4 }
   0x5   :  { %220 = vmatprep.subr.bf16.mxu1 %v263_v1 }
   0x6   :  { %213 = vmatpush3.bf16.msra.mxu0 %v234_v2 }
   0x7   :  { %10 = vsyncpa [#allocation3], 0  ;;  %v237_v7 = vld [vmem:[%s338_s3 + $0x10] sm:$0xff]   ;;  %v238_v8 = vld [vmem:[%s338_s3 + $0x18] sm:$0xff]   ;;  %vm132_vm2 = vcmask 523264   ;;  %s265_s9 = smov [#allocation2]  }
   0x8   :  { %221 = vmatpush3.bf16.msra.mxu1 %v236_v5  ;;  %v192_v9 = vld [vmem:[%s337_s2] ss:$0 sm:$0xff]  ;;  %s184_s3 = sshll.u32 %s265_s9, 4  ;;  %vm176_vm3 = vcmask 130048   ;;  %s185_s3 = int_to_ptr.vmem [resolvable:$true] %s184_s3 }
   0x9   :  { %215 = vmatmul.mubr.msk.bf16.vlgmr.msra.gmra.mrb[0].mxu0 %vm47_vm1, %v23_v6  ;;  %222 = vmatprep.subr.bf16.mxu1 %v263_v1  ;;  %v196_v17 = vld [vmem:[%s339_s4] ss:$0 sm:$0xff]  ;;  %s239_s2 = scalar_lea.vmem %s185_s3, 128  ;;  %p244_p1 = scmp.lt.s32.totalorder %s185_s3, %s185_s3 }
   0xa   :  { %p240_p0 = scmp.ne.s32.totalorder %s185_s3, %s239_s2  ;;  %p245_p2 = scmp.lt.s32.totalorder %s239_s2, %s239_s2 }
   0xc   :  { %223 = vmatpush3.bf16.msra.mxu1 %v237_v7  ;;  %p246_p3 = por %p245_p2, %p244_p1 }
   0xd   :  { %224 = vmatprep.subr.bf16.mxu1 %v263_v1 }
   0xe   :  { %p247_p4 = pnand %p246_p3, %p240_p0 }
  0x10   :  { %225 = vmatpush3.bf16.msra.mxu1 %v238_v8 }
  0xdc   :  { %v85_v10 = vpop.f32.mrb[0].mxu0 }
  0xdd   :  { %v86_v11 = vadd.f32 %v192_v9, %v85_v10  ;;  %v216_v12 = vpop.f32.mrb[1].mxu0 }
  0xde   :  { %v88_v13 = vpop.f32.mrb[2].mxu0 }
  0xdf   :  { %v91_v14 = vmax.f32 %v86_v11, 0.0  ;;  %v217_v15 = vpop.f32.mrb[3].mxu0 }
  0xe1   :  { %v92_v16 = vpack.c.bf16 %v91_v14, %v91_v14 }
  0xe3   :  { %227 = vmatmul.mubr.msk.bf16.vlgmr.msra.gmra.mrb[0].mxu1 %vm132_vm2, %v92_v16 }
 0x1b6   :  { %v170_v18 = vpop.f32.mrb[0].mxu1 }
 0x1b7   :  { %v171_v19 = vadd.f32 %v196_v17, %v170_v18  ;;  %v228_v20 = vpop.f32.mrb[1].mxu1 }
 0x1b8   :  { %v173_v21 = vpop.f32.mrb[2].mxu1 }
 0x1b9   :  { %v229_v22 = vpop.f32.mrb[3].mxu1  ;;  %177 = vst.msk [vmem:[#allocation2] sm:$0xff] %vm176_vm3, %v171_v19 }
 0x1ba   :  { %250 = shalt.err (!%p247_p4)
}
 0x1bb   :  { %s251_s4 = scalar_lea.hbm %s340_s5, 128 }
 0x1bc   :  { %p252_p5 = scmp.ne.s32.totalorder %s340_s5, %s251_s4  ;;  %p255_p6 = scmp.lt.u32.totalorder %s251_s4, %s340_s5 }
 0x1be   :  { %p257_p7 = pnand %p255_p6, %p252_p5 }
 0x1c0   :  { %260 = shalt.err (!%p257_p7)
}
 0x1c1   :  { %187 = dma.vmem_to_hbm [thread:$0]  %s185_s3, 128, %s340_s5, [#allocation3]  }
 0x1c2   :  { %261 = dma.done.wait [#allocation3], 128  }
 0x1c3   :  { %262 = vsyncadd [#allocation3], 4294967168 }
 0x1c4   :  { %191 = vsyncpa [#allocation3], 1 }

</bundles_post_ra>
